<compile_context>
chip_gen: v6e
topology: v6e:2x2x1
jax: 0.10.0
libtpu: 0.0.40
codegen_flags: <defaults>
</compile_context>

<pallas_src>
import jax
import jax.numpy as jnp
from jax import lax
from jax.experimental import pallas as pl
from jax.experimental.pallas import tpu as pltpu


_INV_SQRT2 = 0.7071067811865476


def _erf_approx(x):
    # Abramowitz & Stegun 7.1.26 polynomial, |err| <= 1.5e-7 (matches exact-erf
    # torch.nn.GELU() within f32 tolerance).  Exact reciprocal: the divide is
    # fully hidden under the MXU at these shapes.
    a1, a2, a3, a4, a5 = 0.254829592, -0.284496736, 1.421413741, -1.453152027, 1.061405429
    p = 0.3275911
    z = jnp.abs(x)
    t = 1.0 / (1.0 + p * z)
    poly = ((((a5 * t + a4) * t + a3) * t + a2) * t + a1) * t
    y = 1.0 - poly * jnp.exp(-z * z)
    return jnp.where(x >= 0.0, y, -y)


def _gelu_exact(x):
    # torch.nn.GELU() default (approximate='none'): 0.5*x*(1 + erf(x/sqrt(2)))
    return 0.5 * x * (1.0 + _erf_approx(x * _INV_SQRT2))


def text_encoder2_kernel(x_ref, w_hbm_ref, b_ref, o_ref, w_vmem, dma_sem):
    # The (D, D) bf16 weight lives in HBM (memory_space=pl.ANY) and is DMA'd
    # exactly once into a persistent VMEM scratch: a single resident copy, no
    # double-buffering.  The batch grid axis is "arbitrary" (sequential on one
    # core), so guarding on program_id(0) == 0 is safe.
    @pl.when(pl.program_id(0) == 0)
    def _():
        cp = pltpu.make_async_copy(w_hbm_ref, w_vmem, dma_sem)
        cp.start()
        cp.wait()

    w = w_vmem[...]                    # (D, D)  bf16, already transposed: W^T
    b = b_ref[...]                     # (1, D)  f32
    x = x_ref[...]                     # (tb, D) bf16

    # fc_text -> GELU (first application).  bf16 MXU matmul, f32 accumulation.
    h = jnp.dot(x, w, preferred_element_type=jnp.float32) + b
    h = _gelu_exact(h)
    # fc_text -> GELU (second application of the SAME layer).
    h = jnp.dot(h.astype(jnp.bfloat16), w, preferred_element_type=jnp.float32) + b
    h = _gelu_exact(h)

    # F.normalize(h, dim=-1) = h / max(||h||_2, 1e-12) = h * rsqrt(max(||h||^2, 1e-24))
    sq = jnp.sum(h * h, axis=-1, keepdims=True)
    o_ref[...] = (h * lax.rsqrt(jnp.maximum(sq, 1e-24))).astype(o_ref.dtype)


def _vmem_capacity_bytes():
    try:
        return int(pltpu.get_tpu_info().vmem_capacity_bytes)
    except Exception:
        return 64 * 2 ** 20            # conservative default (v7x per-TC VMEM)


def _pick_tile_and_vmem(B, D):
    """Derive the batch tile from the actual VMEM budget (weight + I/O + temps)."""
    phys = _vmem_capacity_bytes()
    weight_bytes = D * D * 2           # single resident bf16 W^T copy
    bias_bytes = 2 * D * 4             # (1, D) f32, double-buffered (negligible)

    def footprint(tb):
        io = 2 * tb * D * 2 + 2 * tb * D * 4   # dbl-buffered bf16 x tile + f32 out tile
        temps = 8 * tb * D * 4                 # f32 GELU / erf / normalize temporaries
        return weight_bytes + bias_bytes + io + temps

    tb = 8
    for cand in (512, 256, 128, 64, 32, 16, 8):   # 512 on 128 MiB chips, smaller on v7x
        if footprint(cand) <= int(0.8 * phys):
            tb = cand
            break
    if B <= tb:
        tb = B                          # whole batch in one grid step (full-array block)
    vmem_limit = int(min(max(footprint(max(tb, 8)) * 5 // 4, 32 * 2 ** 20),
                         int(phys * 0.9)))
    return tb, vmem_limit


def text_encoder2(x, w_t, b):
    """x: (B, D); w_t: (D, D) = W^T (PyTorch weight transposed); b: (D,)."""
    B, D = x.shape
    assert w_t.shape == (D, D) and b.shape == (D,), "fc_text must be square (applied twice)"

    tb, vmem_limit = _pick_tile_and_vmem(B, D)
    grid = (pl.cdiv(B, tb),)

    # bf16 activations into the kernel (halves x-tile DMA; the MXU path is bf16
    # with f32 accumulation anyway).  No jnp.pad: a ragged final batch block is
    # masked on write by Pallas and rows are independent.
    x_in = x.astype(jnp.bfloat16)
    w_bf16 = w_t.astype(jnp.bfloat16)
    b2 = b.astype(jnp.float32).reshape(1, D)

    cost = pl.CostEstimate(
        flops=4 * B * D * D,                     # two (B,D)x(D,D) matmuls
        transcendentals=4 * B * D + B,           # exp per GELU element + rsqrt per row
        bytes_accessed=B * D * 2 + B * D * 4 + D * D * 2 + D * 4,
    )

    # TODO(synk): for very large D (>~4-5k) the resident D x D bf16 weight no
    # longer fits v7x's 64 MiB VMEM; stream W in N-column tiles with
    # pltpu.emit_pipeline (and add a per-core weight load so the batch axis can
    # be "parallel" across v7x's two TensorCores for large B).
    out = pl.pallas_call(
        text_encoder2_kernel,
        out_shape=jax.ShapeDtypeStruct((B, D), jnp.float32),
        grid_spec=pltpu.PrefetchScalarGridSpec(
            num_scalar_prefetch=0,
            grid=grid,
            in_specs=[
                pl.BlockSpec((tb, D), lambda i: (i, 0)),   # batch tile of x (bf16)
                pl.BlockSpec(memory_space=pl.ANY),         # W^T stays in HBM, manual DMA
                pl.BlockSpec((1, D), lambda i: (0, 0)),    # bias
            ],
            out_specs=pl.BlockSpec((tb, D), lambda i: (i, 0)),
            scratch_shapes=[
                pltpu.VMEM((D, D), jnp.bfloat16),          # single resident weight copy
                pltpu.SemaphoreType.DMA,                   # weight-load completion sem
            ],
        ),
        compiler_params=pltpu.CompilerParams(
            # "arbitrary": sequential grid on one core, which makes the
            # program_id(0)==0 weight load valid with a persistent scratch.
            dimension_semantics=("arbitrary",),
            vmem_limit_bytes=vmem_limit,
        ),
        cost_estimate=cost,
    )(x_in, w_bf16, b2)
    return out


def _reference(x, w_t, b, *, matmul_dtype=jnp.float32):
    # Pure-JAX reference of the PyTorch module.  matmul_dtype=bfloat16 mimics the
    # kernel's bf16-MXU / f32-accumulate path for a tight comparison.
    def gelu(v):
        return 0.5 * v * (1.0 + jax.scipy.special.erf(v / jnp.sqrt(2.0)))

    w = w_t.astype(matmul_dtype)

    def mm(a):
        return jnp.dot(a.astype(matmul_dtype), w, preferred_element_type=jnp.float32)

    h = gelu(mm(x) + b)
    h = gelu(mm(h) + b)
    n = jnp.maximum(jnp.linalg.norm(h, axis=-1, keepdims=True), 1e-12)
    return h / n


if __name__ == "__main__":
    # Small shapes consistent with the module (input_size == output_size is
    # required because the same Linear is applied twice).
    B, D = 8, 256
    key = jax.random.PRNGKey(0)
    kx, kw, kb = jax.random.split(key, 3)

    x = jax.random.normal(kx, (B, D), dtype=jnp.float32)
    # Deterministic synthetic parameters (PyTorch layout: W is (out, in)).
    w_torch = jax.random.normal(kw, (D, D), dtype=jnp.float32) * (1.0 / jnp.sqrt(D))
    bias = jax.random.normal(kb, (D,), dtype=jnp.float32) * 0.02
    w_t = w_torch.T                                 # (in, out) so kernel computes x @ W^T

    out = jax.block_until_ready(text_encoder2(x, w_t, bias))
    assert out.shape == (B, D) and out.dtype == jnp.float32

    # Tight check vs. a reference using the same bf16-matmul / f32-accumulate path.
    ref_bf16 = _reference(x, w_t, bias, matmul_dtype=jnp.bfloat16)
    err_tight = float(jnp.max(jnp.abs(out - ref_bf16)))
    assert err_tight < 5e-3, f"kernel vs bf16-matched reference: {err_tight}"

    # Looser check vs. the pure-f32 PyTorch semantics (bf16 matmul rounding only).
    ref_f32 = _reference(x, w_t, bias, matmul_dtype=jnp.float32)
    err_f32 = float(jnp.max(jnp.abs(out - ref_f32)))
    assert err_f32 < 2e-2, f"kernel vs f32 reference: {err_f32}"

    # Rows must be unit-norm after F.normalize.
    norms = jnp.linalg.norm(out, axis=-1)
    assert jnp.allclose(norms, 1.0, atol=1e-3), float(jnp.max(jnp.abs(norms - 1.0)))

    print("KERNEL_OK")
</pallas_src>

<mosaic_0001>
module attributes {stable_mosaic.version = 11 : i64} {
  func.func @text_encoder2_kernel(%arg0: i32, %arg1: memref<8x256xbf16, #tpu.memory_space<vmem>>, %arg2: memref<256x256xbf16, #tpu.memory_space<any>>, %arg3: memref<1x256xf32, #tpu.memory_space<vmem>>, %arg4: memref<8x256xf32, #tpu.memory_space<vmem>>, %arg5: memref<256x256xbf16, #tpu.memory_space<vmem>>, %arg6: memref<!tpu.dma_semaphore, #tpu.memory_space<semaphore_mem>>) attributes {dimension_semantics = [#tpu.dimension_semantics<arbitrary>], iteration_bounds = array<i64: 1>, scalar_prefetch = 0 : i64, scratch_operands = 2 : i64, tpu.core_type = #tpu.core_type<tc>, window_params = [{transform_indices = @transform_0, window_bounds = array<i64: 8, 256>}, {}, {pipeline_mode = #tpu.pipeline_mode<synchronous>, transform_indices = @transform_2, window_bounds = array<i64: 1, 256>}, {transform_indices = @transform_3, window_bounds = array<i64: 8, 256>}]} {
    %c0_i32 = arith.constant 0 : i32
    %0 = arith.cmpi eq, %arg0, %c0_i32 : i32
    %1 = arith.extui %0 : i1 to i32
    %c0_i32_0 = arith.constant 0 : i32
    %2 = arith.cmpi ne, %1, %c0_i32_0 : i32
    scf.if %2 {
      tpu.enqueue_dma source(%arg2 : memref<256x256xbf16, #tpu.memory_space<any>>) target(%arg5 : memref<256x256xbf16, #tpu.memory_space<vmem>>) target_semaphore(%arg6 : memref<!tpu.dma_semaphore, #tpu.memory_space<semaphore_mem>>)
      tpu.wait_dma2 semaphore(%arg6 : memref<!tpu.dma_semaphore, #tpu.memory_space<semaphore_mem>>) src(%arg2 : memref<256x256xbf16, #tpu.memory_space<any>>) dst(%arg5 : memref<256x256xbf16, #tpu.memory_space<vmem>>)
    } else {
    }
    %c0 = arith.constant 0 : index
    %c0_1 = arith.constant 0 : index
    %3 = vector.load %arg5[%c0, %c0_1] : memref<256x256xbf16, #tpu.memory_space<vmem>>, vector<256x256xbf16>
    %c0_2 = arith.constant 0 : index
    %c0_3 = arith.constant 0 : index
    %4 = vector.load %arg3[%c0_2, %c0_3] : memref<1x256xf32, #tpu.memory_space<vmem>>, vector<1x256xf32>
    %c0_4 = arith.constant 0 : index
    %c0_5 = arith.constant 0 : index
    %5 = vector.load %arg1[%c0_4, %c0_5] : memref<8x256xbf16, #tpu.memory_space<vmem>>, vector<8x256xbf16>
    %cst = arith.constant dense<0.000000e+00> : vector<8x256xf32>
    %6 = tpu.matmul %5, %3, %cst {dimension_numbers = #tpu.dot_dimension_numbers<[1], [0], [0], [1], [0, 0, 1, 1], [], []>} : vector<8x256xbf16>, vector<256x256xbf16>, vector<8x256xf32> -> vector<8x256xf32>
    %7 = vector.broadcast %4 : vector<1x256xf32> to vector<8x256xf32>
    %8 = arith.addf %6, %7 : vector<8x256xf32>
    %cst_6 = arith.constant 5.000000e-01 : f32
    %9 = vector.broadcast %cst_6 : f32 to vector<8x256xf32>
    %10 = arith.mulf %9, %8 : vector<8x256xf32>
    %cst_7 = arith.constant 0.707106769 : f32
    %11 = vector.broadcast %cst_7 : f32 to vector<8x256xf32>
    %12 = arith.mulf %8, %11 : vector<8x256xf32>
    %13 = math.absf %12 : vector<8x256xf32>
    %cst_8 = arith.constant 0.327591091 : f32
    %14 = vector.broadcast %cst_8 : f32 to vector<8x256xf32>
    %15 = arith.mulf %14, %13 : vector<8x256xf32>
    %cst_9 = arith.constant 1.000000e+00 : f32
    %16 = vector.broadcast %cst_9 : f32 to vector<8x256xf32>
    %17 = arith.addf %16, %15 : vector<8x256xf32>
    %cst_10 = arith.constant 1.000000e+00 : f32
    %18 = vector.broadcast %cst_10 : f32 to vector<8x256xf32>
    %19 = arith.divf %18, %17 : vector<8x256xf32>
    %cst_11 = arith.constant 1.06140542 : f32
    %20 = vector.broadcast %cst_11 : f32 to vector<8x256xf32>
    %21 = arith.mulf %20, %19 : vector<8x256xf32>
    %cst_12 = arith.constant -1.45315206 : f32
    %22 = vector.broadcast %cst_12 : f32 to vector<8x256xf32>
    %23 = arith.addf %21, %22 : vector<8x256xf32>
    %24 = arith.mulf %23, %19 : vector<8x256xf32>
    %cst_13 = arith.constant 1.42141378 : f32
    %25 = vector.broadcast %cst_13 : f32 to vector<8x256xf32>
    %26 = arith.addf %24, %25 : vector<8x256xf32>
    %27 = arith.mulf %26, %19 : vector<8x256xf32>
    %cst_14 = arith.constant -0.284496725 : f32
    %28 = vector.broadcast %cst_14 : f32 to vector<8x256xf32>
    %29 = arith.addf %27, %28 : vector<8x256xf32>
    %30 = arith.mulf %29, %19 : vector<8x256xf32>
    %cst_15 = arith.constant 0.254829586 : f32
    %31 = vector.broadcast %cst_15 : f32 to vector<8x256xf32>
    %32 = arith.addf %30, %31 : vector<8x256xf32>
    %33 = arith.mulf %32, %19 : vector<8x256xf32>
    %cst_16 = arith.constant 0.000000e+00 : f32
    %34 = vector.broadcast %cst_16 : f32 to vector<8x256xf32>
    %35 = arith.subf %34, %13 : vector<8x256xf32>
    %36 = arith.mulf %35, %13 : vector<8x256xf32>
    %37 = math.exp %36 : vector<8x256xf32>
    %38 = arith.mulf %33, %37 : vector<8x256xf32>
    %cst_17 = arith.constant 1.000000e+00 : f32
    %39 = vector.broadcast %cst_17 : f32 to vector<8x256xf32>
    %40 = arith.subf %39, %38 : vector<8x256xf32>
    %cst_18 = arith.constant 0.000000e+00 : f32
    %41 = vector.broadcast %cst_18 : f32 to vector<8x256xf32>
    %42 = arith.cmpf oge, %12, %41 : vector<8x256xf32>
    %cst_19 = arith.constant 0.000000e+00 : f32
    %43 = vector.broadcast %cst_19 : f32 to vector<8x256xf32>
    %44 = arith.subf %43, %40 : vector<8x256xf32>
    %45 = arith.select %42, %40, %44 : vector<8x256xi1>, vector<8x256xf32>
    %cst_20 = arith.constant 1.000000e+00 : f32
    %46 = vector.broadcast %cst_20 : f32 to vector<8x256xf32>
    %47 = arith.addf %46, %45 : vector<8x256xf32>
    %48 = arith.mulf %10, %47 : vector<8x256xf32>
    %49 = arith.truncf %48 : vector<8x256xf32> to vector<8x256xbf16>
    %cst_21 = arith.constant dense<0.000000e+00> : vector<8x256xf32>
    %50 = tpu.matmul %49, %3, %cst_21 {dimension_numbers = #tpu.dot_dimension_numbers<[1], [0], [0], [1], [0, 0, 1, 1], [], []>} : vector<8x256xbf16>, vector<256x256xbf16>, vector<8x256xf32> -> vector<8x256xf32>
    %51 = vector.broadcast %4 : vector<1x256xf32> to vector<8x256xf32>
    %52 = arith.addf %50, %51 : vector<8x256xf32>
    %cst_22 = arith.constant 5.000000e-01 : f32
    %53 = vector.broadcast %cst_22 : f32 to vector<8x256xf32>
    %54 = arith.mulf %53, %52 : vector<8x256xf32>
    %cst_23 = arith.constant 0.707106769 : f32
    %55 = vector.broadcast %cst_23 : f32 to vector<8x256xf32>
    %56 = arith.mulf %52, %55 : vector<8x256xf32>
    %57 = math.absf %56 : vector<8x256xf32>
    %cst_24 = arith.constant 0.327591091 : f32
    %58 = vector.broadcast %cst_24 : f32 to vector<8x256xf32>
    %59 = arith.mulf %58, %57 : vector<8x256xf32>
    %cst_25 = arith.constant 1.000000e+00 : f32
    %60 = vector.broadcast %cst_25 : f32 to vector<8x256xf32>
    %61 = arith.addf %60, %59 : vector<8x256xf32>
    %cst_26 = arith.constant 1.000000e+00 : f32
    %62 = vector.broadcast %cst_26 : f32 to vector<8x256xf32>
    %63 = arith.divf %62, %61 : vector<8x256xf32>
    %cst_27 = arith.constant 1.06140542 : f32
    %64 = vector.broadcast %cst_27 : f32 to vector<8x256xf32>
    %65 = arith.mulf %64, %63 : vector<8x256xf32>
    %cst_28 = arith.constant -1.45315206 : f32
    %66 = vector.broadcast %cst_28 : f32 to vector<8x256xf32>
    %67 = arith.addf %65, %66 : vector<8x256xf32>
    %68 = arith.mulf %67, %63 : vector<8x256xf32>
    %cst_29 = arith.constant 1.42141378 : f32
    %69 = vector.broadcast %cst_29 : f32 to vector<8x256xf32>
    %70 = arith.addf %68, %69 : vector<8x256xf32>
    %71 = arith.mulf %70, %63 : vector<8x256xf32>
    %cst_30 = arith.constant -0.284496725 : f32
    %72 = vector.broadcast %cst_30 : f32 to vector<8x256xf32>
    %73 = arith.addf %71, %72 : vector<8x256xf32>
    %74 = arith.mulf %73, %63 : vector<8x256xf32>
    %cst_31 = arith.constant 0.254829586 : f32
    %75 = vector.broadcast %cst_31 : f32 to vector<8x256xf32>
    %76 = arith.addf %74, %75 : vector<8x256xf32>
    %77 = arith.mulf %76, %63 : vector<8x256xf32>
    %cst_32 = arith.constant 0.000000e+00 : f32
    %78 = vector.broadcast %cst_32 : f32 to vector<8x256xf32>
    %79 = arith.subf %78, %57 : vector<8x256xf32>
    %80 = arith.mulf %79, %57 : vector<8x256xf32>
    %81 = math.exp %80 : vector<8x256xf32>
    %82 = arith.mulf %77, %81 : vector<8x256xf32>
    %cst_33 = arith.constant 1.000000e+00 : f32
    %83 = vector.broadcast %cst_33 : f32 to vector<8x256xf32>
    %84 = arith.subf %83, %82 : vector<8x256xf32>
    %cst_34 = arith.constant 0.000000e+00 : f32
    %85 = vector.broadcast %cst_34 : f32 to vector<8x256xf32>
    %86 = arith.cmpf oge, %56, %85 : vector<8x256xf32>
    %cst_35 = arith.constant 0.000000e+00 : f32
    %87 = vector.broadcast %cst_35 : f32 to vector<8x256xf32>
    %88 = arith.subf %87, %84 : vector<8x256xf32>
    %89 = arith.select %86, %84, %88 : vector<8x256xi1>, vector<8x256xf32>
    %cst_36 = arith.constant 1.000000e+00 : f32
    %90 = vector.broadcast %cst_36 : f32 to vector<8x256xf32>
    %91 = arith.addf %90, %89 : vector<8x256xf32>
    %92 = arith.mulf %54, %91 : vector<8x256xf32>
    %93 = arith.mulf %92, %92 : vector<8x256xf32>
    %cst_37 = arith.constant dense<0.000000e+00> : vector<8xf32>
    %94 = vector.multi_reduction <add>, %93, %cst_37 [1] : vector<8x256xf32> to vector<8xf32>
    %95 = vector.shape_cast %94 : vector<8xf32> to vector<8x1xf32>
    %cst_38 = arith.constant 1.000000e-24 : f32
    %96 = vector.broadcast %cst_38 : f32 to vector<8x1xf32>
    %97 = arith.maximumf %95, %96 : vector<8x1xf32>
    %98 = math.rsqrt %97 : vector<8x1xf32>
    %99 = vector.broadcast %98 : vector<8x1xf32> to vector<8x256xf32>
    %100 = arith.mulf %92, %99 : vector<8x256xf32>
    %c0_39 = arith.constant 0 : index
    %c0_40 = arith.constant 0 : index
    %101 = vector.load %arg4[%c0_39, %c0_40] : memref<8x256xf32, #tpu.memory_space<vmem>>, vector<8x256xf32>
    tpu.vector_store %arg4[%c0_39, %c0_40], %100 {strides = array<i32>} : memref<8x256xf32, #tpu.memory_space<vmem>>, vector<8x256xf32>,
    return
  }
  func.func @transform_0(%arg0: i32) -> (i32, i32) {
    %c0_i32 = arith.constant 0 : i32
    %c0_i32_0 = arith.constant 0 : i32
    return %arg0, %c0_i32 : i32, i32
  }
  func.func @transform_2(%arg0: i32) -> (i32, i32) {
    %c0_i32 = arith.constant 0 : i32
    %c0_i32_0 = arith.constant 0 : i32
    %c0_i32_1 = arith.constant 0 : i32
    return %c0_i32, %c0_i32_0 : i32, i32
  }
  func.func @transform_3(%arg0: i32) -> (i32, i32) {
    %c0_i32 = arith.constant 0 : i32
    %c0_i32_0 = arith.constant 0 : i32
    return %arg0, %c0_i32 : i32, i32
  }
}

</mosaic_0001>

<bundles_post_ra>
// kernel: tpu_custom_call.1
= control target key start
LH: loop header
LB: loop body
LE: loop exit
PB: predicated region body
PF: predicated region fallthrough
CT: control target
= control target key end

     0   :  { %8 = vsyncpa [#allocation5], 0  ;;  %s701_s0 = inlined_call_operand.hbm [shape: bf16[8,256], index: 0, kind: input, shape index: {}]   ;;  %s702_s1 = inlined_call_operand.hbm [shape: bf16[256,256], index: 1, kind: input, shape index: {}]   ;;  %s703_s2 = inlined_call_operand.vmem [shape: f32[1,256], index: 2, kind: input, shape index: {}]   ;;  %s704_s3 = inlined_call_operand.hbm [shape: f32[8,256], index: 3, kind: output, shape index: {}]  }
   0x1   :  { %9 = vsyncpa [#allocation6], 0  ;;  %s652_s12 = smov [#allocation4]  }
   0x2   :  { %s16_s13 = sshll.u32 %s652_s12, 4  ;;  %s17_s13 = int_to_ptr.vmem [resolvable:$true] %s16_s13 }
   0x3   :  { %s594_s14 = scalar_lea.vmem %s17_s13, 128  ;;  %p599_p1 = scmp.lt.s32.totalorder %s17_s13, %s17_s13 }
   0x4   :  { %p595_p0 = scmp.ne.s32.totalorder %s17_s13, %s594_s14  ;;  %p600_p2 = scmp.lt.s32.totalorder %s594_s14, %s594_s14 }
   0x6   :  { %p601_p3 = por %p600_p2, %p599_p1 }
   0x8   :  { %p602_p4 = pnand %p601_p3, %p595_p0 }
   0xa   :  { %605 = shalt.err (!%p602_p4)
}
   0xb   :  { %19 = dma.hbm_to_vmem [thread:$0]  %s701_s0, 128, %s17_s13, [#allocation5]  }
   0xc   :  { %646 = dma.done.wait [#allocation5], 128  }
   0xd   :  { %647 = vsyncadd [#allocation5], 4294967168  ;;  %s653_s17 = smov [#allocation2]  }
   0xe   :  { %s36_s18 = sshll.u32 %s653_s17, 4  ;;  %s37_s18 = int_to_ptr.vmem [resolvable:$true] %s36_s18 }
   0xf   :  { %s614_s19 = scalar_lea.vmem %s37_s18, 4096  ;;  %p619_p6 = scmp.lt.s32.totalorder %s37_s18, %s37_s18 }
  0x10   :  { %p615_p5 = scmp.ne.s32.totalorder %s37_s18, %s614_s19  ;;  %p620_p7 = scmp.lt.s32.totalorder %s614_s19, %s614_s19 }
  0x12   :  { %p621_p8 = por %p620_p7, %p619_p6 }
  0x14   :  { %p622_p9 = pnand %p621_p8, %p615_p5 }
  0x16   :  { %625 = shalt.err (!%p622_p9)  }
  0x17   :  { %39 = dma.hbm_to_vmem [thread:$0]  %s702_s1, 4096, %s37_s18, [#allocation3] }
  0x18   :  { %648 = dma.done.wait [#allocation3], 4096 }
  0x19   :  { %649 = vsyncadd [#allocation3], 4294963200  ;;  %v518_v0 = vld [vmem:[#allocation2 + $0x74] ss:$8 sps:$4 sm:$0xff]   ;;  %v520_v1 = vld [vmem:[#allocation2 + $0x70] ss:$8 sps:$4 sm:$0xff]   ;;  %v79_v35 = vlaneseq }
  0x1a   :  { %256 = vmatprep.subr.bf16.mxu0 %v518_v0  ;;  %v521_v2 = vld [vmem:[#allocation2 + $0x64] ss:$8 sps:$4 sm:$0xff]   ;;  %353 = vmatprep.subr.bf16.mxu1 %v518_v0  ;;  %v523_v3 = vld [vmem:[#allocation2 + $0x60] ss:$8 sps:$4 sm:$0xff]   ;;  %v524_v4 = vld [vmem:[#allocation2 + $0x54] ss:$8 sps:$4 sm:$0xff]  }
  0x1b   :  { %257 = vmatpush1.bf16.msra.mxu0 %v520_v1  ;;  %354 = vmatpush1.bf16.msra.mxu1 %v520_v1  ;;  %v526_v5 = vld [vmem:[#allocation2 + $0x50] ss:$8 sps:$4 sm:$0xff]   ;;  %v527_v6 = vld [vmem:[#allocation2 + $0x44] ss:$8 sps:$4 sm:$0xff]   ;;  %v529_v7 = vld [vmem:[#allocation2 + $0x40] ss:$8 sps:$4 sm:$0xff]  }
  0x1c   :  { %258 = vmatprep.subr.bf16.mxu0 %v521_v2  ;;  %355 = vmatprep.subr.bf16.mxu1 %v521_v2  ;;  %v530_v8 = vld [vmem:[#allocation2 + $0x34] ss:$8 sps:$4 sm:$0xff]   ;;  %v532_v9 = vld [vmem:[#allocation2 + $0x30] ss:$8 sps:$4 sm:$0xff]   ;;  %v533_v10 = vld [vmem:[#allocation2 + $0x24] ss:$8 sps:$4 sm:$0xff]  }
  0x1d   :  { %v535_v11 = vld [vmem:[#allocation2 + $0x20] ss:$8 sps:$4 sm:$0xff]   ;;  %v536_v12 = vld [vmem:[#allocation2 + $0x14] ss:$8 sps:$4 sm:$0xff]   ;;  %v538_v15 = vld [vmem:[#allocation2 + $0x10] ss:$8 sps:$4 sm:$0xff]  }
  0x1e   :  { %v681_v13 = vld [vmem:[#allocation4] sm:$0xff]  ;;  %v542_v18 = vld [vmem:[#allocation2 + $0xf4] ss:$8 sps:$4 sm:$0xff]   ;;  %v544_v19 = vld [vmem:[#allocation2 + $0xf0] ss:$8 sps:$4 sm:$0xff]   ;;  %v80_v36 = vshrl.u32 %v79_v35, 7 }
  0x1f   :  { %259 = vmatpush1.bf16.msra.mxu0 %v523_v3  ;;  %356 = vmatpush1.bf16.msra.mxu1 %v523_v3  ;;  %v481_v14 = vcombine.high %v681_v13, %v681_v13  ;;  %v539_v16 = vld [vmem:[#allocation2 + $0x4] ss:$8 sps:$4 sm:$0xff]   ;;  %v541_v17 = vld [vmem:[#allocation2] ss:$8 sps:$4 sm:$0xff]   ;;  %v548_v22 = vld [vmem:[#allocation2 + $0xd4] ss:$8 sps:$4 sm:$0xff]   ;;  %v480_v34 = vcombine.low %v681_v13, %v681_v13 }
  0x20   :  { %260 = vmatprep.subr.bf16.mxu0 %v524_v4  ;;  %357 = vmatprep.subr.bf16.mxu1 %v524_v4  ;;  %v545_v20 = vld [vmem:[#allocation2 + $0xe4] ss:$8 sps:$4 sm:$0xff]   ;;  %v547_v21 = vld [vmem:[#allocation2 + $0xe0] ss:$8 sps:$4 sm:$0xff]   ;;  %v550_v23 = vld [vmem:[#allocation2 + $0xd0] ss:$8 sps:$4 sm:$0xff]  }
  0x21   :  { %288 = vmatprep.mubr.bf16.mxu0 %v481_v14  ;;  %v551_v24 = vld [vmem:[#allocation2 + $0xc4] ss:$8 sps:$4 sm:$0xff]   ;;  %v553_v25 = vld [vmem:[#allocation2 + $0xc0] ss:$8 sps:$4 sm:$0xff]   ;;  %v554_v26 = vld [vmem:[#allocation2 + $0xb4] ss:$8 sps:$4 sm:$0xff]  }
  0x22   :  { %v556_v27 = vld [vmem:[#allocation2 + $0xb0] ss:$8 sps:$4 sm:$0xff]   ;;  %v557_v28 = vld [vmem:[#allocation2 + $0xa4] ss:$8 sps:$4 sm:$0xff]   ;;  %v559_v29 = vld [vmem:[#allocation2 + $0xa0] ss:$8 sps:$4 sm:$0xff]  }
  0x23   :  { %261 = vmatpush1.bf16.msra.mxu0 %v526_v5  ;;  %358 = vmatpush1.bf16.msra.mxu1 %v526_v5  ;;  %v560_v30 = vld [vmem:[#allocation2 + $0x94] ss:$8 sps:$4 sm:$0xff]   ;;  %v562_v31 = vld [vmem:[#allocation2 + $0x90] ss:$8 sps:$4 sm:$0xff]   ;;  %v563_v32 = vld [vmem:[#allocation2 + $0x84] ss:$8 sps:$4 sm:$0xff]  }
  0x24   :  { %262 = vmatprep.subr.bf16.mxu0 %v527_v6  ;;  %359 = vmatprep.subr.bf16.mxu1 %v527_v6  ;;  %v565_v33 = vld [vmem:[#allocation2 + $0x80] ss:$8 sps:$4 sm:$0xff]   ;;  %v81_v37 = vsub.s32 0, %v80_v36  ;;  %v85_v39 = vsub.s32 1, %v80_v36 }
  0x25   :  { %v76_v38 = vld [vmem:[%s703_s2] sm:$0x3]  ;;  %s654_s2 = smov [#allocation7]  }
  0x26   :  { %v690_v40 = vrot.slane %v76_v38, %v81_v37  ;;  %v692_v41 = vrot.slane %v76_v38, %v85_v39  ;;  %s465_s22 = sshll.u32 %s654_s2, 4  ;;  %s466_s22 = int_to_ptr.vmem [resolvable:$true] %s465_s22 }
  0x27   :  { %263 = vmatpush1.bf16.msra.mxu0 %v529_v7  ;;  %360 = vmatpush1.bf16.msra.mxu1 %v529_v7  ;;  %s626_s23 = scalar_lea.vmem %s466_s22, 256  ;;  %p631_p11 = scmp.lt.s32.totalorder %s466_s22, %s466_s22 }
  0x28   :  { %264 = vmatprep.subr.bf16.mxu0 %v530_v8  ;;  %361 = vmatprep.subr.bf16.mxu1 %v530_v8  ;;  %p627_p10 = scmp.ne.s32.totalorder %s466_s22, %s626_s23  ;;  %p632_p12 = scmp.lt.s32.totalorder %s626_s23, %s626_s23 }
  0x2a   :  { %p633_p13 = por %p632_p12, %p631_p11 }
  0x2b   :  { %265 = vmatpush1.bf16.msra.mxu0 %v532_v9  ;;  %362 = vmatpush1.bf16.msra.mxu1 %v532_v9 }
  0x2c   :  { %266 = vmatprep.subr.bf16.mxu0 %v533_v10  ;;  %363 = vmatprep.subr.bf16.mxu1 %v533_v10  ;;  %p634_p0 = pnand %p633_p13, %p627_p10 }
  0x2f   :  { %267 = vmatpush1.bf16.msra.mxu0 %v535_v11  ;;  %364 = vmatpush1.bf16.msra.mxu1 %v535_v11 }
  0x30   :  { %268 = vmatprep.subr.bf16.mxu0 %v536_v12  ;;  %365 = vmatprep.subr.bf16.mxu1 %v536_v12 }
  0x33   :  { %269 = vmatpush1.bf16.msra.mxu0 %v538_v15  ;;  %366 = vmatpush1.bf16.msra.mxu1 %v538_v15 }
  0x34   :  { %270 = vmatprep.subr.bf16.mxu0 %v539_v16  ;;  %367 = vmatprep.subr.bf16.mxu1 %v539_v16 }
  0x37   :  { %271 = vmatpush1.bf16.msra.mxu0 %v541_v17  ;;  %368 = vmatpush1.bf16.msra.mxu1 %v541_v17 }
  0x38   :  { %272 = vmatprep.subr.bf16.mxu0 %v542_v18  ;;  %369 = vmatprep.subr.bf16.mxu1 %v542_v18 }
  0x3b   :  { %273 = vmatpush2.bf16.msra.mxu0 %v544_v19  ;;  %370 = vmatpush2.bf16.msra.mxu1 %v544_v19 }
  0x3c   :  { %274 = vmatprep.subr.bf16.mxu0 %v545_v20  ;;  %371 = vmatprep.subr.bf16.mxu1 %v545_v20 }
  0x3f   :  { %275 = vmatpush2.bf16.msra.mxu0 %v547_v21  ;;  %372 = vmatpush2.bf16.msra.mxu1 %v547_v21 }
  0x40   :  { %276 = vmatprep.subr.bf16.mxu0 %v548_v22  ;;  %373 = vmatprep.subr.bf16.mxu1 %v548_v22 }
  0x43   :  { %277 = vmatpush2.bf16.msra.mxu0 %v550_v23  ;;  %374 = vmatpush2.bf16.msra.mxu1 %v550_v23 }
  0x44   :  { %278 = vmatprep.subr.bf16.mxu0 %v551_v24  ;;  %375 = vmatprep.subr.bf16.mxu1 %v551_v24 }
  0x47   :  { %279 = vmatpush2.bf16.msra.mxu0 %v553_v25  ;;  %376 = vmatpush2.bf16.msra.mxu1 %v553_v25 }
  0x48   :  { %280 = vmatprep.subr.bf16.mxu0 %v554_v26  ;;  %377 = vmatprep.subr.bf16.mxu1 %v554_v26 }
  0x4b   :  { %281 = vmatpush2.bf16.msra.mxu0 %v556_v27  ;;  %378 = vmatpush2.bf16.msra.mxu1 %v556_v27 }
  0x4c   :  { %282 = vmatprep.subr.bf16.mxu0 %v557_v28  ;;  %379 = vmatprep.subr.bf16.mxu1 %v557_v28 }
  0x4f   :  { %283 = vmatpush2.bf16.msra.mxu0 %v559_v29  ;;  %380 = vmatpush2.bf16.msra.mxu1 %v559_v29 }
  0x50   :  { %284 = vmatprep.subr.bf16.mxu0 %v560_v30  ;;  %381 = vmatprep.subr.bf16.mxu1 %v560_v30 }
  0x53   :  { %285 = vmatpush2.bf16.msra.mxu0 %v562_v31  ;;  %382 = vmatpush2.bf16.msra.mxu1 %v562_v31 }
  0x54   :  { %286 = vmatprep.subr.bf16.mxu0 %v563_v32  ;;  %383 = vmatprep.subr.bf16.mxu1 %v563_v32 }
  0x57   :  { %287 = vmatpush2.bf16.msra.mxu0 %v565_v33  ;;  %384 = vmatpush2.bf16.msra.mxu1 %v565_v33 }
  0x5a   :  { %289 = vmatmul.mubr.bf16.vlgmr.msra.gmra.mxu0 %v480_v34 }
 0x11a   :  { %v290_v42 = vpop.f32.mrf.mxu0 }
 0x11b   :  { %v291_v43 = vadd.f32 %v290_v42, %v690_v40 }
 0x11c   :  { %v292_v44 = vpop.f32.mrf.mxu0 }
 0x11d   :  { %v299_v45 = vmul.f32 0.70710677, %v291_v43  ;;  %v293_v46 = vadd.f32 %v292_v44, %v692_v41  ;;  %v297_v28 = vmul.f32 0.5, %v291_v43 }
 0x11e   :  { %v294_v47 = vpop.f32.mrf.mxu0 }
 0x11f   :  { %v301_v48 = vand.u32 2147483647, %v299_v45  ;;  %v300_v49 = vmul.f32 0.70710677, %v293_v46  ;;  %vm341_vm0 = vcmp.ge.f32.partialorder %v299_v45, 0.0  ;;  %v298_v30 = vmul.f32 0.5, %v293_v46 }
 0x120   :  { %v295_v50 = vpop.f32.mrf.mxu0 }
 0x121   :  { %v303_v51 = vmul.f32 0.3275911, %v301_v48  ;;  %v302_v52 = vand.u32 2147483647, %v300_v49  ;;  %v329_v56 = vsub.f32 0.0, %v301_v48  ;;  %vm342_vm1 = vcmp.ge.f32.partialorder %v300_v49, 0.0 }
 0x123   :  { %v305_v53 = vadd.f32 1.0, %v303_v51  ;;  %v304_v54 = vmul.f32 0.3275911, %v302_v52  ;;  %v330_v57 = vsub.f32 0.0, %v302_v52  ;;  %v331_v58 = vmul.f32 %v329_v56, %v301_v48 }
 0x125   :  { %568 = vrcp.f32 %v305_v53  ;;  %v306_v55 = vadd.f32 1.0, %v304_v54  ;;  %v332_v60 = vmul.f32 %v330_v57, %v302_v52  ;;  %v333_v61 = vmul.f32 1.442695, %v331_v58 }
 0x127   :  { %570 = vrcp.f32 %v306_v55  ;;  %v335_v1 = vmul.f32 1.442695, %v332_v60 }
 0x128   :  { %572 = vpow2.f32 %v333_v61 }
 0x129   :  { %574 = vpow2.f32 %v335_v1 }
 0x132   :  { %v569_v59 = vpop.eup %568 }
 0x133   :  { %v311_v62 = vmul.f32 1.0614054, %v569_v59 }
 0x134   :  { %v571_v63 = vpop.eup %570 }
 0x135   :  { %v313_v0 = vadd.f32 -1.4531521, %v311_v62  ;;  %v312_v2 = vmul.f32 1.0614054, %v571_v63  ;;  %v573_v16 = vpop.eup %572 }
 0x136   :  { %v575_v20 = vpop.eup %574 }
 0x137   :  { %v315_v3 = vmul.f32 %v569_v59, %v313_v0  ;;  %v314_v4 = vadd.f32 -1.4531521, %v312_v2 }
 0x139   :  { %v317_v5 = vadd.f32 1.4214138, %v315_v3  ;;  %v316_v6 = vmul.f32 %v571_v63, %v314_v4 }
 0x13b   :  { %v319_v7 = vmul.f32 %v569_v59, %v317_v5  ;;  %v318_v8 = vadd.f32 1.4214138, %v316_v6 }
 0x13d   :  { %v321_v9 = vadd.f32 -0.28449672, %v319_v7  ;;  %v320_v10 = vmul.f32 %v571_v63, %v318_v8 }
 0x13f   :  { %v323_v11 = vmul.f32 %v569_v59, %v321_v9  ;;  %v322_v12 = vadd.f32 -0.28449672, %v320_v10 }
 0x141   :  { %v325_v13 = vadd.f32 0.2548296, %v323_v11  ;;  %v324_v14 = vmul.f32 %v571_v63, %v322_v12 }
 0x143   :  { %v327_v15 = vmul.f32 %v569_v59, %v325_v13  ;;  %v326_v17 = vadd.f32 0.2548296, %v324_v14 }
 0x145   :  { %v337_v18 = vmul.f32 %v573_v16, %v327_v15  ;;  %v328_v19 = vmul.f32 %v571_v63, %v326_v17 }
 0x147   :  { %v339_v21 = vsub.f32 1.0, %v337_v18  ;;  %v338_v22 = vmul.f32 %v575_v20, %v328_v19 }
 0x149   :  { %v343_v23 = vsub.f32 0.0, %v339_v21  ;;  %v340_v24 = vsub.f32 1.0, %v338_v22 }
 0x14b   :  { %v345_v25 = vsel %vm341_vm0, %v339_v21, %v343_v23  ;;  %v344_v26 = vsub.f32 0.0, %v340_v24 }
 0x14c   :  { %v347_v27 = vadd.f32 1.0, %v345_v25 }
 0x14d   :  { %v346_v29 = vsel %vm342_vm1, %v340_v24, %v344_v26 }
 0x14e   :  { %v348_v31 = vadd.f32 1.0, %v346_v29  ;;  %v349_v32 = vmul.f32 %v347_v27, %v297_v28 }
 0x150   :  { %v350_v33 = vmul.f32 %v348_v31, %v298_v30  ;;  %v351_v35 = vpack.c.bf16 %v349_v32, %v349_v32 }
 0x152   :  { %v352_v34 = vpack.c.bf16 %v350_v33, %v350_v33 }
 0x154   :  { %385 = vmatprep.mubr.bf16.mxu1 %v352_v34 }
 0x155   :  { %386 = vmatmul.mubr.bf16.vlgmr.msra.gmra.mxu1 %v351_v35 }
 0x215   :  { %v387_v36 = vpop.f32.mrf.mxu1 }
 0x216   :  { %v388_v37 = vadd.f32 %v387_v36, %v690_v40 }
 0x217   :  { %v389_v38 = vpop.f32.mrf.mxu1 }
 0x218   :  { %v396_v39 = vmul.f32 0.70710677, %v388_v37  ;;  %v390_v42 = vadd.f32 %v389_v38, %v692_v41  ;;  %v394_v22 = vmul.f32 0.5, %v388_v37 }
 0x219   :  { %v391_v44 = vpop.f32.mrf.mxu1 }
 0x21a   :  { %v398_v45 = vand.u32 2147483647, %v396_v39  ;;  %v397_v47 = vmul.f32 0.70710677, %v390_v42  ;;  %vm438_vm2 = vcmp.ge.f32.partialorder %v396_v39, 0.0  ;;  %v395_v24 = vmul.f32 0.5, %v390_v42 }
 0x21b   :  { %v392_v43 = vpop.f32.mrf.mxu1 }
 0x21c   :  { %v400_v48 = vmul.f32 0.3275911, %v398_v45  ;;  %v399_v46 = vand.u32 2147483647, %v397_v47  ;;  %v426_v52 = vsub.f32 0.0, %v398_v45  ;;  %vm439_vm3 = vcmp.ge.f32.partialorder %v397_v47, 0.0 }
 0x21e   :  { %v402_v49 = vadd.f32 1.0, %v400_v48  ;;  %v401_v50 = vmul.f32 0.3275911, %v399_v46  ;;  %v427_v53 = vsub.f32 0.0, %v399_v46  ;;  %v428_v54 = vmul.f32 %v426_v52, %v398_v45 }
 0x220   :  { %576 = vrcp.f32 %v402_v49  ;;  %v403_v51 = vadd.f32 1.0, %v401_v50  ;;  %v429_v40 = vmul.f32 %v427_v53, %v399_v46  ;;  %v430_v56 = vmul.f32 1.442695, %v428_v54 }
 0x222   :  { %578 = vrcp.f32 %v403_v51  ;;  %v432_v59 = vmul.f32 1.442695, %v429_v40 }
 0x223   :  { %580 = vpow2.f32 %v430_v56 }
 0x224   :  { %582 = vpow2.f32 %v432_v59 }
 0x22d   :  { %v577_v55 = vpop.eup %576 }
 0x22e   :  { %v408_v57 = vmul.f32 1.0614054, %v577_v55 }
 0x22f   :  { %v579_v58 = vpop.eup %578 }
 0x230   :  { %v410_v41 = vadd.f32 -1.4531521, %v408_v57  ;;  %v409_v60 = vmul.f32 1.0614054, %v579_v58  ;;  %v581_v10 = vpop.eup %580 }
 0x231   :  { %v583_v14 = vpop.eup %582 }
 0x232   :  { %v412_v61 = vmul.f32 %v577_v55, %v410_v41  ;;  %v411_v62 = vadd.f32 -1.4531521, %v409_v60 }
 0x234   :  { %v414_v63 = vadd.f32 1.4214138, %v412_v61  ;;  %v413_v0 = vmul.f32 %v579_v58, %v411_v62 }
 0x236   :  { %v416_v1 = vmul.f32 %v577_v55, %v414_v63  ;;  %v415_v2 = vadd.f32 1.4214138, %v413_v0 }
 0x238   :  { %v418_v3 = vadd.f32 -0.28449672, %v416_v1  ;;  %v417_v4 = vmul.f32 %v579_v58, %v415_v2 }
 0x23a   :  { %v420_v5 = vmul.f32 %v577_v55, %v418_v3  ;;  %v419_v6 = vadd.f32 -0.28449672, %v417_v4 }
 0x23c   :  { %v422_v7 = vadd.f32 0.2548296, %v420_v5  ;;  %v421_v8 = vmul.f32 %v579_v58, %v419_v6 }
 0x23e   :  { %v424_v9 = vmul.f32 %v577_v55, %v422_v7  ;;  %v423_v11 = vadd.f32 0.2548296, %v421_v8 }
 0x240   :  { %v434_v12 = vmul.f32 %v581_v10, %v424_v9  ;;  %v425_v13 = vmul.f32 %v579_v58, %v423_v11 }
 0x242   :  { %v436_v15 = vsub.f32 1.0, %v434_v12  ;;  %v435_v16 = vmul.f32 %v583_v14, %v425_v13 }
 0x244   :  { %v440_v17 = vsub.f32 0.0, %v436_v15  ;;  %v437_v18 = vsub.f32 1.0, %v435_v16 }
 0x246   :  { %v442_v19 = vsel %vm438_vm2, %v436_v15, %v440_v17  ;;  %v441_v20 = vsub.f32 0.0, %v437_v18 }
 0x247   :  { %v444_v21 = vadd.f32 1.0, %v442_v19 }
 0x248   :  { %v443_v23 = vsel %vm439_vm3, %v437_v18, %v441_v20 }
 0x249   :  { %v445_v25 = vadd.f32 1.0, %v443_v23  ;;  %v446_v26 = vmul.f32 %v444_v21, %v394_v22 }
 0x24b   :  { %v447_v27 = vmul.f32 %v445_v25, %v395_v24  ;;  %v448_v28 = vmul.f32 %v446_v26, %v446_v26 }
 0x24d   :  { %v449_v29 = vmul.f32 %v447_v27, %v447_v27 }
 0x24f   :  { %v450_v30 = vadd.f32 %v449_v29, %v448_v28 }
 0x251   :  { %451 = vadd.xlane.f32.xlu0 %v450_v30 }
 0x2da   :  { %v452_v31 = vpop.xlane.xlu0 %451 }
 0x2db   :  { %v453_v32 = vmax.f32 %v452_v31, 1e-24 }
 0x2dd   :  { %584 = vrsqrt.f32 %v453_v32 }
 0x2ea   :  { %v585_v33 = vpop.eup %584 }
 0x2eb   :  { %v455_v34 = vmul.f32 %v585_v33, %v446_v26  ;;  %v456_v35 = vmul.f32 %v585_v33, %v447_v27 }
 0x2ed   :  { %457 = vst [vmem:[#allocation7] sm:$0xff] %v455_v34  ;;  %458 = vst [vmem:[#allocation7 + $0x8] sm:$0xff] %v456_v35 }
 0x2ee   :  { %637 = shalt.err (!%p634_p0)
}
 0x2ef   :  { %468 = dma.vmem_to_hbm [thread:$0]  %s466_s22, 256, %s704_s3, [#allocation6]  }
 0x2f0   :  { %650 = dma.done.wait [#allocation6], 256  }
 0x2f1   :  { %651 = vsyncadd [#allocation6], 4294967040 }
 0x2f2   :  { %472 = vsyncpa [#allocation5], 1 }
 0x2f3   :  { %473 = vsyncpa [#allocation6], 1 }
 0x2f4   :  { %474 = vsyncmov [#allocation3] }
 0x2f7   :  { %s475_s26 = vpop.sfrf %474 }
 0x2f8   :  { %p514_p1 = scmp.ne.s32.totalorder %s475_s26, 0 }
 0x2fa   :  { %479 = shalt.err (%p514_p1)  }

</bundles_post_ra>
